<compile_context>
chip_gen: v7x
topology: tpu7x:2x2x1
jax: 0.10.0
libtpu: 0.0.40
codegen_flags: <defaults>
</compile_context>

<pallas_src>
import functools
from types import SimpleNamespace

import jax
import jax.numpy as jnp
from jax import lax
from jax.experimental import pallas as pl
from jax.experimental.pallas import tpu as pltpu

MAX_FLOW = 400.0
_ALPHA = 0.45          # charbonnier exponent
_EPS2 = 1.0e-6         # epsilon**2 with epsilon = 0.001


def _charb(x):
    # (x^2 + eps^2) ** alpha, elementwise; argument strictly positive -> log is safe.
    return jnp.exp(_ALPHA * jnp.log(x * x + _EPS2))


def _round_up(x, m):
    return ((x + m - 1) // m) * m


def _vmem_limit_bytes():
    # ~100 MiB on v5e/v6e (128 MiB physical), ~48 MiB on v7x (64 MiB physical);
    # leaves headroom for double-buffered BlockSpec inputs + Mosaic internal scratch.
    try:
        cap = int(pltpu.get_tpu_info().vmem_capacity_bytes)
    except Exception:
        cap = 64 << 20
    return max(32 << 20, min(100 << 20, cap - (16 << 20)))


def _pick_hw_tile(hw, target):
    # Largest multiple of 128 that divides HW and is <= target.
    if hw <= target:
        return hw
    t = (target // 128) * 128
    while t >= 128:
        if hw % t == 0:
            return t
        t -= 128
    # TODO(synk): HW with no 128-multiple divisor (e.g. KITTI 375*1242) needs the HW
    #   axis zero-padded to a multiple of 128 plus an in-bounds multiplier applied
    #   *after* the charbonnier; fall back to a single untiled sweep for now.
    return hw


# ----------------------------------------------------------------------------
# Fused kernel: photometric (separable bilinear flow-warp + masked charbonnier,
# accumulated over HW tiles) and 8-connected smoothness (once per (b, pred)).
# ----------------------------------------------------------------------------
def _fused_kernel(prev_ref, next_ref, flow_t_ref, flow_full_ref, fgt_ref, valid_ref,
                  out_ref, *, H, W, C, T, use_bf16):
    HW = H * W
    t_id = pl.program_id(2)
    row2 = lax.broadcasted_iota(jnp.int32, (2, 128), 0)   # selects photo / smooth row

    # ---- smoothness: once per (b, pred); needs only the resident (2, HW) flow ----
    @pl.when(t_id == 0)
    def _():
        flow = flow_full_ref[...].reshape(2, HW)
        pidx = lax.broadcasted_iota(jnp.float32, (1, HW), 1)   # exact ints for HW < 2^24
        row = jnp.floor(pidx / W)

        def nbr(delta):
            # neighbour values + neighbour flat indices (for validity masking)
            return (pltpu.roll(flow, shift=HW - delta, axis=1),
                    pltpu.roll(pidx, shift=HW - delta, axis=1))

        f_v, i_v = nbr(W)        # row +/- 1, same column
        f_h, i_h = nbr(1)        # same row, column +/- 1
        f_d, i_d = nbr(W + 1)    # main-diagonal neighbour
        # Masks built from the *rolled iota*: correct regardless of the roll-direction
        # convention (charbonnier is even, only the pair-set matters) and they drop
        # circular-wrap / row-crossing neighbour pairs.  Requires H, W >= 3.
        m_v = (jnp.abs(i_v - pidx) == float(W)).astype(jnp.float32)
        m_h = jnp.logical_and(jnp.abs(i_h - pidx) == 1.0,
                              jnp.floor(i_h / W) == row).astype(jnp.float32)
        m_d = jnp.logical_and(jnp.abs(i_d - pidx) == float(W + 1),
                              jnp.abs(jnp.floor(i_d / W) - row) == 1.0).astype(jnp.float32)
        m_a = m_v * m_h          # anti-diagonal pair (f_h, f_v)

        s = (jnp.sum(m_v * _charb(f_v - flow)) * (1.0 / (2.0 * (H - 1) * W))
             + jnp.sum(m_h * _charb(f_h - flow)) * (1.0 / (2.0 * H * (W - 1)))
             + jnp.sum(m_d * _charb(f_d - flow)) * (1.0 / (2.0 * (H - 1) * (W - 1)))
             + jnp.sum(m_a * _charb(f_h - f_v)) * (1.0 / (2.0 * (H - 1) * (W - 1))))
        # init: photo row <- 0, smooth row <- value (single lane-dense store)
        out_ref[...] = jnp.where(row2 == 0, 0.0, 0.25 * s).reshape(1, 1, 2, 128)

    # ---- photometric warp for this HW tile ----
    fl = flow_t_ref[...].reshape(2, T)
    fg = fgt_ref[...].reshape(2, T)
    v = valid_ref[...].reshape(1, T)
    prv = prev_ref[...].reshape(C, T)

    # validity mask (valid >= 0.5 & ||flow_gt|| < MAX_FLOW); recomputed per tile (cheap,
    # keeps all coordinate/mask vectors tile-sized instead of (1, HW) long-lived rows).
    mag = jnp.sqrt(fg[0:1, :] ** 2 + fg[1:2, :] ** 2)
    mask = jnp.logical_and(v >= 0.5, mag < MAX_FLOW).astype(jnp.float32)     # (1, T)

    # base pixel coordinates of this tile (mesh_grid equivalent, no DMA)
    pidx = lax.broadcasted_iota(jnp.float32, (1, T), 1) + (t_id * T).astype(jnp.float32)
    yb = jnp.floor(pidx / W)
    xb = pidx - yb * W

    # flow_warp + grid_sample(bilinear, 'border', align_corners=True) == sampling
    # `next` at the clamped absolute coords (x + fx, y + fy).
    sx = jnp.clip(xb + fl[0:1, :], 0.0, float(W - 1))
    sy = jnp.clip(yb + fl[1:2, :], 0.0, float(H - 1))

    # Two-tap bilinear gather kernels in tent form (exactly the bilinear weights after
    # the clip).  Built in f32 (v5e VPU has no bf16 VALU); cast only at the dot.
    xi = lax.broadcasted_iota(jnp.float32, (W, T), 0)
    yi = lax.broadcasted_iota(jnp.float32, (H, T), 0)
    kx = jnp.maximum(0.0, 1.0 - jnp.abs(xi - sx))            # (W, T)
    ky = jnp.maximum(0.0, 1.0 - jnp.abs(yi - sy))            # (H, T)

    nxt = next_ref[...].reshape(C * H, W)
    # TODO(synk): for production W not a multiple of the MXU dim (128 on v5e, 256 on
    #   v6e/v7x), pad `next` along W with zeros (tent weights for xi >= W are already 0).
    if use_bf16:
        nxt = nxt.astype(jnp.bfloat16)
        kx = kx.astype(jnp.bfloat16)

    # Per channel: MXU x-contraction fused with the ky sublane reduce -> largest live
    # temporary is (H, T); no (C*H, T) block and no concatenate relayout.
    psum = jnp.float32(0.0)
    for c in range(C):                                       # static unroll, C is tiny
        t_c = jnp.dot(nxt[c * H:(c + 1) * H, :], kx,
                      preferred_element_type=jnp.float32)    # (H, T)
        w_c = jnp.sum(t_c * ky, axis=0, keepdims=True)       # (1, T)  warped channel c
        d_c = mask * (w_c - prv[c:c + 1, :])                 # mask-then-charbonnier
        psum = psum + jnp.sum(_charb(d_c))

    out_ref[...] += jnp.where(row2 == 0, psum * (1.0 / float(C * HW)),
                              0.0).reshape(1, 1, 2, 128)


def fused_photo_smooth(prev_f, next_rw, flows, fgt_f, valid_f, H, W, *,
                       hw_tile=4096, use_bf16=True):
    """prev_f (B,C,HW)  next_rw (B,C*H,W)  flows (P,B,2,HW)  fgt_f (B,2,HW)  valid_f (B,1,HW)
       returns (B, P, 2, 128): row 0 = photometric mean, row 1 = smoothness mean."""
    P, B = flows.shape[0], flows.shape[1]
    C = prev_f.shape[1]
    HW = H * W
    # HW (lane) tile: 4K columns fits every generation under the explicit vmem limit;
    # v5e/v6e (128 MiB VMEM) can take 8-16K, v7x (64 MiB) 4-6K.
    T = _pick_hw_tile(HW, hw_tile)
    n_t = HW // T
    kern = functools.partial(_fused_kernel, H=H, W=W, C=C, T=T, use_bf16=use_bf16)
    return pl.pallas_call(
        kern,
        out_shape=jax.ShapeDtypeStruct((B, P, 2, 128), jnp.float32),
        grid=(B, P, n_t),
        in_specs=[
            pl.BlockSpec((1, C, T), lambda b, p, t: (b, 0, t)),          # prev   (tiled)
            pl.BlockSpec((1, C * H, W), lambda b, p, t: (b, 0, 0)),      # next   (resident)
            pl.BlockSpec((1, 1, 2, T), lambda b, p, t: (p, b, 0, t)),    # flow   (tiled)
            pl.BlockSpec((1, 1, 2, HW), lambda b, p, t: (p, b, 0, 0)),   # flow   (resident, for smoothness)
            pl.BlockSpec((1, 2, T), lambda b, p, t: (b, 0, t)),          # flow_gt(tiled)
            pl.BlockSpec((1, 1, T), lambda b, p, t: (b, 0, t)),          # valid  (tiled)
        ],
        out_specs=pl.BlockSpec((1, 1, 2, 128), lambda b, p, t: (b, p, 0, 0)),
        compiler_params=pltpu.CompilerParams(
            dimension_semantics=("parallel", "parallel", "arbitrary"),
            vmem_limit_bytes=_vmem_limit_bytes()),
    )(prev_f, next_rw, flows, flows, fgt_f, valid_f)


# ----------------------------------------------------------------------------
# Weight regularizer  sum((pt - ft)^2) on a sublane/lane-dense (rows, 128) layout
# ----------------------------------------------------------------------------
def _wreg_kernel(a_ref, b_ref, out_ref):
    @pl.when(pl.program_id(0) == 0)
    def _():
        out_ref[...] = jnp.zeros_like(out_ref)
    d = a_ref[...] - b_ref[...]
    out_ref[...] += jnp.sum(d * d)


def weight_reg(a2d, b2d, tile_rows):
    R = a2d.shape[0]
    return pl.pallas_call(
        _wreg_kernel,
        out_shape=jax.ShapeDtypeStruct((1, 1), jnp.float32),
        grid=(R // tile_rows,),
        in_specs=[pl.BlockSpec((tile_rows, 128), lambda i: (i, 0)),
                  pl.BlockSpec((tile_rows, 128), lambda i: (i, 0))],
        out_specs=pl.BlockSpec((1, 1), lambda i: (0, 0)),
        compiler_params=pltpu.CompilerParams(
            dimension_semantics=("arbitrary",),
            vmem_limit_bytes=_vmem_limit_bytes()),
    )(a2d, b2d)


def _pack_params(params, names, rows):
    leaves = [jnp.ravel(params[k]).astype(jnp.float32) for k in names]
    v = jnp.concatenate(leaves)
    v = jnp.pad(v, (0, rows * 128 - v.shape[0]))    # zero pad contributes 0 to the sum
    return v.reshape(rows, 128)


# ----------------------------------------------------------------------------
# Forward pass (same semantics as PhotoSmoothLoss.forward)
# ----------------------------------------------------------------------------
def photo_smooth_loss_forward(prev_images, next_images, flow, flow_gt, valid,
                              gamma, pt_params, ft_params, args,
                              smoothness_weight=0.5, hw_tile=4096,
                              use_bf16_matmul=True):
    B, C, H, W = prev_images.shape
    HW = H * W

    # ---- weight keeper: sum over params of ||pt - ft||^2 (lane-dense, tiled) ----
    names = sorted(pt_params)
    if names != sorted(ft_params):
        raise ValueError('parameter name not matched')
    n_par = sum(int(pt_params[k].size) for k in names)
    rows0 = max(1, -(-n_par // 128))
    tile_rows = 1024 if rows0 >= 1024 else _round_up(rows0, 8)
    rows = _round_up(rows0, tile_rows)
    wreg = weight_reg(_pack_params(pt_params, names, rows),
                      _pack_params(ft_params, names, rows), tile_rows)[0, 0]

    # ---- flow predictions (list like the torch module, or pre-stacked array) ----
    start_iter = 0 if args.loss_iters else args.iters - 1
    if isinstance(flow, (list, tuple)):
        n_predictions = len(flow)
        # NOTE: stacking the python list costs one extra HBM round trip; pass a
        # pre-stacked (P, B, 2, H, W) array to avoid it.
        flows = jnp.stack([flow[i].reshape(B, 2, HW)
                           for i in range(start_iter, n_predictions)],
                          axis=0).astype(jnp.float32)
        flow_last = flow[-1]
    else:
        n_predictions = flow.shape[0]
        flows = flow[start_iter:].reshape(-1, B, 2, HW).astype(jnp.float32)
        flow_last = flow[-1]

    # TODO(synk): compute_photometric_loss's PIL to_pil_image/resize/to_tensor round
    #   trip (uint8 quantize + resize to the flow resolution) is assumed identity --
    #   images are already at flow resolution in [0, 1].
    # TODO(synk): only the args.first_order / args==None grid_sample path (bilinear,
    #   border padding, align_corners=True) is implemented; the custom second-order
    #   grid_sample is not.
    # TODO(synk): forward only -- training through this loss needs a custom_vjp with
    #   an analytic backward, since pallas_call is not differentiable.
    prev_f = prev_images.reshape(B, C, HW).astype(jnp.float32)
    next_rw = next_images.reshape(B, C * H, W).astype(jnp.float32)
    fgt_f = flow_gt.reshape(B, 2, HW).astype(jnp.float32)
    valid_f = valid.reshape(B, 1, HW).astype(jnp.float32)

    out = fused_photo_smooth(prev_f, next_rw, flows, fgt_f, valid_f, H, W,
                             hw_tile=hw_tile, use_bf16=use_bf16_matmul)
    photo_p = out[:, :, 0, 0]       # (B, P) per-item photometric means
    smooth_p = out[:, :, 1, 0]      # (B, P) per-item smoothness means

    pred_ids = jnp.arange(start_iter, n_predictions)
    i_weights = jnp.float32(gamma) ** (n_predictions - 1 - pred_ids).astype(jnp.float32)
    photometric = jnp.sum(photo_p, axis=0) / B       # batch-averaged, per prediction
    smoothness = jnp.mean(smooth_p, axis=0)          # batch-averaged, per prediction
    flow_loss = jnp.sum(i_weights * (photometric + smoothness_weight * smoothness))

    total_loss = flow_loss + args.wkeeper * wreg

    # ---- EPE on the last prediction (plain JAX: 2 VPU ops/pixel; keeping it out of
    #      the kernel lets both the batch and prediction grid axes stay parallel).
    #      Stays a device scalar (no .item()/float() host sync mid-forward). ----
    flow_last = flow_last.astype(jnp.float32)
    fgt = flow_gt.astype(jnp.float32)
    vmask = jnp.logical_and(valid.astype(jnp.float32) >= 0.5,
                            jnp.sqrt(jnp.sum(fgt ** 2, axis=1)) < MAX_FLOW)
    maskf = vmask.astype(jnp.float32)
    epe_map = jnp.sqrt(jnp.sum((flow_last - fgt) ** 2, axis=1))
    epe = jnp.sum(epe_map * maskf) / jnp.maximum(jnp.sum(maskf), 1.0)
    return total_loss, {"epe": epe}


if __name__ == "__main__":
    key = jax.random.PRNGKey(0)
    B, C, H, W = 2, 3, 16, 16
    n_pred = 3
    keys = jax.random.split(key, 6 + n_pred)

    prev_images = jax.random.uniform(keys[0], (B, C, H, W), jnp.float32)
    next_images = jax.random.uniform(keys[1], (B, C, H, W), jnp.float32)
    flow_gt = 3.0 * jax.random.normal(keys[2], (B, 2, H, W), jnp.float32)
    valid = jax.random.uniform(keys[3], (B, H, W), jnp.float32)
    flow = [2.0 * jax.random.normal(keys[4 + i], (B, 2, H, W), jnp.float32)
            for i in range(n_pred)]
    gamma = 0.8

    def make_params(k, scale):
        ks = jax.random.split(k, 3)
        return {
            "enc.weight": scale * jax.random.normal(ks[0], (32, 64), jnp.float32),
            "enc.bias": scale * jax.random.normal(ks[1], (64,), jnp.float32),
            "dec.weight": scale * jax.random.normal(ks[2], (64, 16), jnp.float32),
        }

    pt_params = make_params(keys[4 + n_pred], 0.10)
    ft_params = make_params(keys[5 + n_pred], 0.11)

    args = SimpleNamespace(wkeeper=0.01, iters=n_pred, loss_iters=True, first_order=True)

    total_loss, metrics = photo_smooth_loss_forward(
        prev_images, next_images, flow, flow_gt, valid, gamma,
        pt_params, ft_params, args, smoothness_weight=0.5)

    jax.block_until_ready((total_loss, metrics["epe"]))
    print("KERNEL_OK")
</pallas_src>

<mosaic_0001>
module attributes {stable_mosaic.version = 11 : i64} {
  func.func @_wreg_kernel(%arg0: i32, %arg1: memref<32x128xf32, #tpu.memory_space<vmem>>, %arg2: memref<32x128xf32, #tpu.memory_space<vmem>>, %arg3: memref<1x1xf32, #tpu.memory_space<vmem>>) attributes {dimension_semantics = [#tpu.dimension_semantics<arbitrary>], iteration_bounds = array<i64: 1>, scalar_prefetch = 0 : i64, scratch_operands = 0 : i64, tpu.core_type = #tpu.core_type<tc>, window_params = [{transform_indices = @transform_0, window_bounds = array<i64: 32, 128>}, {transform_indices = @transform_1, window_bounds = array<i64: 32, 128>}, {pipeline_mode = #tpu.pipeline_mode<synchronous>, transform_indices = @transform_2, window_bounds = array<i64: 1, 1>}]} {
    %c0_i32 = arith.constant 0 : i32
    %0 = arith.cmpi eq, %arg0, %c0_i32 : i32
    %1 = arith.extui %0 : i1 to i32
    %c0_i32_0 = arith.constant 0 : i32
    %2 = arith.cmpi ne, %1, %c0_i32_0 : i32
    scf.if %2 {
      %cst_8 = arith.constant 0.000000e+00 : f32
      %15 = vector.broadcast %cst_8 : f32 to vector<1x1xf32>
      %c0_9 = arith.constant 0 : index
      %c0_10 = arith.constant 0 : index
      %16 = vector.load %arg3[%c0_9, %c0_10] : memref<1x1xf32, #tpu.memory_space<vmem>>, vector<1x1xf32>
      tpu.vector_store %arg3[%c0_9, %c0_10], %15 {strides = array<i32>} : memref<1x1xf32, #tpu.memory_space<vmem>>, vector<1x1xf32>,
    } else {
    }
    %c0 = arith.constant 0 : index
    %c0_1 = arith.constant 0 : index
    %3 = vector.load %arg1[%c0, %c0_1] : memref<32x128xf32, #tpu.memory_space<vmem>>, vector<32x128xf32>
    %c0_2 = arith.constant 0 : index
    %c0_3 = arith.constant 0 : index
    %4 = vector.load %arg2[%c0_2, %c0_3] : memref<32x128xf32, #tpu.memory_space<vmem>>, vector<32x128xf32>
    %5 = arith.subf %3, %4 : vector<32x128xf32>
    %c0_4 = arith.constant 0 : index
    %c0_5 = arith.constant 0 : index
    %6 = vector.load %arg3[%c0_4, %c0_5] : memref<1x1xf32, #tpu.memory_space<vmem>>, vector<1x1xf32>
    %7 = arith.mulf %5, %5 : vector<32x128xf32>
    %8 = vector.shape_cast %7 : vector<32x128xf32> to vector<1x32x128xf32>
    %cst = arith.constant dense<0.000000e+00> : vector<1xf32>
    %9 = vector.multi_reduction <add>, %8, %cst [1, 2] : vector<1x32x128xf32> to vector<1xf32>
    %10 = vector.shape_cast %9 : vector<1xf32> to vector<1x1x1xf32>
    %11 = vector.extract %10[0, 0, 0] : f32 from vector<1x1x1xf32>
    %12 = vector.broadcast %11 : f32 to vector<1x1xf32>
    %13 = arith.addf %6, %12 : vector<1x1xf32>
    %c0_6 = arith.constant 0 : index
    %c0_7 = arith.constant 0 : index
    %14 = vector.load %arg3[%c0_6, %c0_7] : memref<1x1xf32, #tpu.memory_space<vmem>>, vector<1x1xf32>
    tpu.vector_store %arg3[%c0_6, %c0_7], %13 {strides = array<i32>} : memref<1x1xf32, #tpu.memory_space<vmem>>, vector<1x1xf32>,
    return
  }
  func.func @transform_0(%arg0: i32) -> (i32, i32) {
    %c0_i32 = arith.constant 0 : i32
    %c0_i32_0 = arith.constant 0 : i32
    return %arg0, %c0_i32 : i32, i32
  }
  func.func @transform_1(%arg0: i32) -> (i32, i32) {
    %c0_i32 = arith.constant 0 : i32
    %c0_i32_0 = arith.constant 0 : i32
    return %arg0, %c0_i32 : i32, i32
  }
  func.func @transform_2(%arg0: i32) -> (i32, i32) {
    %c0_i32 = arith.constant 0 : i32
    %c0_i32_0 = arith.constant 0 : i32
    %c0_i32_1 = arith.constant 0 : i32
    return %c0_i32, %c0_i32_0 : i32, i32
  }
}

</mosaic_0001>

<bundles_post_ra>
// kernel: tpu_custom_call.1
= control target key start
LH: loop header
LB: loop body
LE: loop exit
PB: predicated region body
PF: predicated region fallthrough
CT: control target
= control target key end

     0   :  { %7 = vsyncpa [#allocation3], 0  ;;  %s234_s0 = inlined_call_operand.hbm [shape: f32[32,128], index: 0, kind: input, shape index: {}]   ;;  %s235_s1 = inlined_call_operand.hbm [shape: f32[32,128], index: 1, kind: input, shape index: {}]   ;;  %s236_s2 = inlined_call_operand.hbm [shape: f32[1,1], index: 2, kind: output, shape index: {}]  }
   0x1   :  { %8 = vsyncpa [#allocation6], 0 }
   0x2   :  { %9 = vsyncpa [#allocation4], 0  ;;  %s175_s9 = smov [#allocation2]   ;;  %s103_s13 = scalar_lea.hbm %s234_s0, 512 }
   0x3   :  { %s15_s10 = sshll.u32 %s175_s9, 4  ;;  %p104_p0 = scmp.ne.s32.totalorder %s234_s0, %s103_s13  ;;  %s16_s10 = int_to_ptr.vmem [resolvable:$true] %s15_s10 }
   0x4   :  { %p107_p1 = scmp.lt.u32.totalorder %s103_s13, %s234_s0 }
   0x6   :  { %p109_p2 = pnand %p107_p1, %p104_p0 }
   0x8   :  { %112 = shalt.err (!%p109_p2)
}
   0x9   :  { %s113_s18 = scalar_lea.vmem %s16_s10, 512  ;;  %p118_p4 = scmp.lt.s32.totalorder %s16_s10, %s16_s10 }
   0xa   :  { %p114_p3 = scmp.ne.s32.totalorder %s16_s10, %s113_s18  ;;  %p119_p5 = scmp.lt.s32.totalorder %s113_s18, %s113_s18 }
   0xc   :  { %p120_p6 = por %p119_p5, %p118_p4 }
   0xe   :  { %p121_p7 = pnand %p120_p6, %p114_p3 }
  0x10   :  { %124 = shalt.err (!%p121_p7)
}
  0x11   :  { %s176_s19 = smov 128   ;;  %s177_s20 = smov 8  }
  0x12   :  { %21 = dma.hbm_to_vmem [thread:$0]  %s234_s0, 512, %s16_s10, [#allocation3], %s176_s19, %s176_s19, %s177_s20  }
  0x13   :  { %s178_s23 = smov [#allocation5]   ;;  %s125_s27 = scalar_lea.hbm %s235_s1, 512 }
  0x14   :  { %s27_s24 = sshll.u32 %s178_s23, 4  ;;  %p126_p8 = scmp.ne.s32.totalorder %s235_s1, %s125_s27  ;;  %s28_s24 = int_to_ptr.vmem [resolvable:$true] %s27_s24 }
  0x15   :  { %p129_p9 = scmp.lt.u32.totalorder %s125_s27, %s235_s1 }
  0x17   :  { %p131_p10 = pnand %p129_p9, %p126_p8 }
  0x19   :  { %134 = shalt.err (!%p131_p10)
}
  0x1a   :  { %s135_s4 = scalar_lea.vmem %s28_s24, 512  ;;  %p140_p12 = scmp.lt.s32.totalorder %s28_s24, %s28_s24 }
  0x1b   :  { %p136_p11 = scmp.ne.s32.totalorder %s28_s24, %s135_s4  ;;  %p141_p13 = scmp.lt.s32.totalorder %s135_s4, %s135_s4 }
  0x1d   :  { %p142_p0 = por %p141_p13, %p140_p12 }
  0x1f   :  { %p143_p1 = pnand %p142_p0, %p136_p11 }
  0x21   :  { %146 = shalt.err (!%p143_p1)
}
  0x22   :  { %33 = dma.hbm_to_vmem [thread:$0]  %s235_s1, 512, %s28_s24, [#allocation6], %s176_s19, %s176_s19, %s177_s20  }
  0x23   :  { %169 = dma.done.wait [#allocation3], 512  }
  0x24   :  { %170 = vsyncadd [#allocation3], 4294966784 }
  0x25   :  { %171 = dma.done.wait [#allocation6], 512  }
  0x26   :  { %172 = vsyncadd [#allocation6], 4294966784  ;;  %v46_v0 = vld [vmem:[#allocation2] sm:$0xff]  ;;  %v47_v1 = vld [vmem:[#allocation2 + $0x8] sm:$0xff]  ;;  %vm44_vm0 = vcmask 0   ;;  %v179_v19 = vmov 0.0  }
  0x27   :  { %v48_v2 = vld [vmem:[#allocation2 + $0x10] sm:$0xff]  ;;  %v49_v3 = vld [vmem:[#allocation2 + $0x18] sm:$0xff]  ;;  %v50_v4 = vld [vmem:[#allocation5] sm:$0xff]  ;;  %45 = vst.msk [vmem:[#allocation7] sm:$0x1] %vm44_vm0, %v179_v19  ;;  %s180_s1 = smov [#allocation7]  }
  0x28   :  { %v51_v5 = vld [vmem:[#allocation5 + $0x8] sm:$0xff]  ;;  %v52_v6 = vld [vmem:[#allocation5 + $0x10] sm:$0xff]  ;;  %v53_v7 = vld [vmem:[#allocation5 + $0x18] sm:$0xff]  ;;  %v54_v8 = vsub.f32 %v46_v0, %v50_v4  ;;  %s85_s6 = sshll.u32 %s180_s1, 4  ;;  %s86_s6 = int_to_ptr.vmem [resolvable:$true] %s85_s6 }
  0x29   :  { %v55_v9 = vsub.f32 %v47_v1, %v51_v5  ;;  %v56_v10 = vsub.f32 %v48_v2, %v52_v6  ;;  %v57_v11 = vsub.f32 %v49_v3, %v53_v7  ;;  %s147_s8 = scalar_lea.vmem %s86_s6, 16  ;;  %s151_s9 = scalar_lea.vmem %s86_s6, 32 }
  0x2a   :  { %v59_v12 = vmul.f32 %v54_v8, %v54_v8  ;;  %p148_p2 = scmp.ne.s32.totalorder %s86_s6, %s147_s8  ;;  %p152_p3 = scmp.lt.s32.totalorder %s86_s6, %s86_s6 }
  0x2b   :  { %v60_v13 = vmul.f32 %v55_v9, %v55_v9  ;;  %v61_v14 = vmul.f32 %v56_v10, %v56_v10  ;;  %v62_v15 = vmul.f32 %v57_v11, %v57_v11  ;;  %p153_p4 = scmp.lt.s32.totalorder %s151_s9, %s147_s8 }
  0x2d   :  { %v63_v16 = vadd.f32 %v60_v13, %v59_v12  ;;  %p154_p5 = por %p153_p4, %p152_p3 }
  0x2e   :  { %v58_v27 = vld [vmem:[#allocation7] sm:$0x1] }
  0x2f   :  { %v64_v17 = vadd.f32 %v63_v16, %v61_v14  ;;  %p155_p6 = pnand %p154_p5, %p148_p2 }
  0x31   :  { %v65_v18 = vadd.f32 %v64_v17, %v62_v15 }
  0x33   :  { %66 = vadd.xlane.f32.xlu0 %v65_v18 }
  0xc0   :  { %v67_v20 = vpop.xlane.xlu0 %66 }
  0xc1   :  { %v68_v21 = vrot.slane %v67_v20, 4 }
  0xc3   :  { %v69_v22 = vadd.f32 %v68_v21, %v67_v20 }
  0xc5   :  { %v70_v23 = vrot.slane %v69_v22, 2 }
  0xc7   :  { %v71_v24 = vadd.f32 %v70_v23, %v69_v22 }
  0xc9   :  { %v72_v25 = vrot.slane %v71_v24, 1 }
  0xcb   :  { %v73_v26 = vadd.f32 %v72_v25, %v71_v24 }
  0xcd   :  { %95 = vpush %v73_v26 }
  0xfe   :  { %s96_s7 = spop %95 }
  0xff   :  { %v75_v28 = vstv %s96_s7 }
 0x100   :  { %v76_v29 = vadd.f32 %v75_v28, %v58_v27 }
 0x102   :  { %78 = vst.msk [vmem:[#allocation7] sm:$0x1] %vm44_vm0, %v76_v29 }
 0x103   :  { %158 = shalt.err (!%p155_p6)
}
 0x104   :  { %s159_s12 = scalar_lea.hbm %s236_s2, 16 }
 0x105   :  { %p160_p7 = scmp.ne.s32.totalorder %s236_s2, %s159_s12  ;;  %p163_p8 = scmp.lt.u32.totalorder %s159_s12, %s236_s2 }
 0x107   :  { %p165_p9 = pnand %p163_p8, %p160_p7 }
 0x109   :  { %168 = shalt.err (!%p165_p9)
}
 0x10a   :  { %88 = dma.vmem_to_hbm [thread:$0]  %s86_s6, 16, %s236_s2, [#allocation4]  }
 0x10b   :  { %173 = dma.done.wait [#allocation4], 16  }
 0x10c   :  { %174 = vsyncadd [#allocation4], 4294967280 }
 0x10d   :  { %92 = vsyncpa [#allocation3], 1 }
 0x10e   :  { %93 = vsyncpa [#allocation6], 1 }
 0x10f   :  { %94 = vsyncpa [#allocation4], 1 }

</bundles_post_ra>
